<compile_context>
chip_gen: v6e
topology: v6e:2x2x1
jax: 0.10.0
libtpu: 0.0.40
codegen_flags: <defaults>
</compile_context>

<pallas_src>
import jax
import jax.numpy as jnp
from jax.experimental import pallas as pl
from jax.experimental.pallas import tpu as pltpu

_SUB = 8        # sublanes per f32 vreg
_LANE = 128     # lanes per vreg
_HIDDEN = 4     # fc1 output width


def _mlp_kernel(p_ref, x_ref, o_ref):
    """Elementwise MLP on one lane-dense (8, TILE_COLS) block.

    p_ref (SMEM, shape (13,)): [w1_0..3, b1_0..3, w2_0..3, b2]
    """
    # Hoist the 13 SMEM scalar reads once per block.
    w1 = [p_ref[j] for j in range(_HIDDEN)]
    b1 = [p_ref[_HIDDEN + j] for j in range(_HIDDEN)]
    w2 = [p_ref[2 * _HIDDEN + j] for j in range(_HIDDEN)]
    b2 = p_ref[3 * _HIDDEN]

    x = x_ref[...]
    y = jnp.full_like(x, b2)
    # Unrolled over the 4 hidden units: VPU FMAs + EUP sigmoids, no MXU/XLU.
    for j in range(_HIDDEN):
        h = jax.nn.sigmoid(x * w1[j] + b1[j])
        y = y + h * w2[j]
    o_ref[...] = y


def net_forward(x, w1, b1, w2, b2, *, max_tile_cols=16384):
    """Fused forward of Net: sigmoid(x @ w1.T + b1) @ w2.T + b2.

    x:  (N, 1) float32
    w1: (4, 1), b1: (4,), w2: (1, 4), b2: (1,)  -- PyTorch nn.Linear layouts.
    Returns (N, 1) float32 (caller-visible layout unchanged).
    """
    N = x.shape[0]

    # Pack the 13 scalars once; they ride in SMEM via scalar prefetch.
    params = jnp.concatenate(
        [w1.reshape(-1), b1.reshape(-1), w2.reshape(-1), b2.reshape(-1)]
    ).astype(jnp.float32)

    # Lane-dense repacking: columns needed for 8 sublanes, rounded up to a full
    # lane multiple, then to whole tiles.  For N=100 this is one (8, 128) vreg.
    cols = pl.cdiv(pl.cdiv(N, _SUB), _LANE) * _LANE        # multiple of 128
    tile_cols = min(cols, max_tile_cols)                    # big lane-dense tile
    cols = pl.cdiv(cols, tile_cols) * tile_cols             # whole tiles
    n_pad = _SUB * cols

    xf = jnp.pad(x.reshape(-1).astype(jnp.float32), (0, n_pad - N))
    x2 = xf.reshape(_SUB, cols)

    out2 = pl.pallas_call(
        _mlp_kernel,
        out_shape=jax.ShapeDtypeStruct((_SUB, cols), jnp.float32),
        grid_spec=pltpu.PrefetchScalarGridSpec(
            num_scalar_prefetch=1,
            grid=(cols // tile_cols,),
            in_specs=[pl.BlockSpec((_SUB, tile_cols), lambda i, p: (0, i))],
            out_specs=pl.BlockSpec((_SUB, tile_cols), lambda i, p: (0, i)),
        ),
        compiler_params=pltpu.CompilerParams(
            dimension_semantics=("parallel",),
        ),
    )(params, x2)

    # Drop padding and restore the caller-visible (N, 1) layout.
    return out2.reshape(-1)[:N].reshape(N, 1)


if __name__ == "__main__":
    key = jax.random.PRNGKey(0)
    k1, k2, k3, k4 = jax.random.split(key, 4)

    # PyTorch nn.Linear layouts: fc1.weight (4,1), fc1.bias (4,);
    #                            fc2.weight (1,4), fc2.bias (1,).
    w1 = jax.random.normal(k1, (4, 1), dtype=jnp.float32) * 0.5
    b1 = jax.random.normal(k2, (4,), dtype=jnp.float32) * 0.1
    w2 = jax.random.normal(k3, (1, 4), dtype=jnp.float32) * 0.5
    b2 = jax.random.normal(k4, (1,), dtype=jnp.float32) * 0.1

    # Input matches the reference script: linspace(-6, 6, 100).view(-1, 1)
    x = jnp.linspace(-6.0, 6.0, 100, dtype=jnp.float32).reshape(-1, 1)

    y = net_forward(x, w1, b1, w2, b2)
    jax.block_until_ready(y)

    # Pure-JAX reference.
    y_ref = jax.nn.sigmoid(x @ w1.T + b1) @ w2.T + b2
    assert y.shape == (100, 1)
    assert jnp.allclose(y, y_ref, atol=1e-5, rtol=1e-5)

    print("KERNEL_OK")
</pallas_src>

<mosaic_0001>
module attributes {stable_mosaic.version = 11 : i64} {
  func.func @_mlp_kernel(%arg0: i32, %arg1: memref<13xf32, #tpu.memory_space<smem>>, %arg2: memref<8x128xf32, #tpu.memory_space<vmem>>, %arg3: memref<8x128xf32, #tpu.memory_space<vmem>>) attributes {dimension_semantics = [#tpu.dimension_semantics<parallel>], iteration_bounds = array<i64: 1>, scalar_prefetch = 1 : i64, scratch_operands = 0 : i64, tpu.core_type = #tpu.core_type<tc>, window_params = [{transform_indices = @transform_0, window_bounds = array<i64: 8, 128>}, {transform_indices = @transform_1, window_bounds = array<i64: 8, 128>}]} {
    %c0 = arith.constant 0 : index
    %0 = memref.load %arg1[%c0] : memref<13xf32, #tpu.memory_space<smem>>
    %c1 = arith.constant 1 : index
    %1 = memref.load %arg1[%c1] : memref<13xf32, #tpu.memory_space<smem>>
    %c2 = arith.constant 2 : index
    %2 = memref.load %arg1[%c2] : memref<13xf32, #tpu.memory_space<smem>>
    %c3 = arith.constant 3 : index
    %3 = memref.load %arg1[%c3] : memref<13xf32, #tpu.memory_space<smem>>
    %c4 = arith.constant 4 : index
    %4 = memref.load %arg1[%c4] : memref<13xf32, #tpu.memory_space<smem>>
    %c5 = arith.constant 5 : index
    %5 = memref.load %arg1[%c5] : memref<13xf32, #tpu.memory_space<smem>>
    %c6 = arith.constant 6 : index
    %6 = memref.load %arg1[%c6] : memref<13xf32, #tpu.memory_space<smem>>
    %c7 = arith.constant 7 : index
    %7 = memref.load %arg1[%c7] : memref<13xf32, #tpu.memory_space<smem>>
    %c8 = arith.constant 8 : index
    %8 = memref.load %arg1[%c8] : memref<13xf32, #tpu.memory_space<smem>>
    %c9 = arith.constant 9 : index
    %9 = memref.load %arg1[%c9] : memref<13xf32, #tpu.memory_space<smem>>
    %c10 = arith.constant 10 : index
    %10 = memref.load %arg1[%c10] : memref<13xf32, #tpu.memory_space<smem>>
    %c11 = arith.constant 11 : index
    %11 = memref.load %arg1[%c11] : memref<13xf32, #tpu.memory_space<smem>>
    %c12 = arith.constant 12 : index
    %12 = memref.load %arg1[%c12] : memref<13xf32, #tpu.memory_space<smem>>
    %c0_0 = arith.constant 0 : index
    %c0_1 = arith.constant 0 : index
    %13 = vector.load %arg2[%c0_0, %c0_1] : memref<8x128xf32, #tpu.memory_space<vmem>>, vector<8x128xf32>
    %14 = vector.broadcast %12 : f32 to vector<8x128xf32>
    %15 = vector.broadcast %0 : f32 to vector<8x128xf32>
    %16 = arith.mulf %13, %15 : vector<8x128xf32>
    %17 = vector.broadcast %4 : f32 to vector<8x128xf32>
    %18 = arith.addf %16, %17 : vector<8x128xf32>
    %19 = arith.negf %18 : vector<8x128xf32>
    %20 = math.exp %19 : vector<8x128xf32>
    %cst = arith.constant 1.000000e+00 : f32
    %21 = vector.broadcast %cst : f32 to vector<8x128xf32>
    %22 = arith.addf %21, %20 : vector<8x128xf32>
    %23 = arith.divf %21, %22 : vector<8x128xf32>
    %24 = vector.broadcast %8 : f32 to vector<8x128xf32>
    %25 = arith.mulf %23, %24 : vector<8x128xf32>
    %26 = arith.addf %14, %25 : vector<8x128xf32>
    %27 = vector.broadcast %1 : f32 to vector<8x128xf32>
    %28 = arith.mulf %13, %27 : vector<8x128xf32>
    %29 = vector.broadcast %5 : f32 to vector<8x128xf32>
    %30 = arith.addf %28, %29 : vector<8x128xf32>
    %31 = arith.negf %30 : vector<8x128xf32>
    %32 = math.exp %31 : vector<8x128xf32>
    %cst_2 = arith.constant 1.000000e+00 : f32
    %33 = vector.broadcast %cst_2 : f32 to vector<8x128xf32>
    %34 = arith.addf %33, %32 : vector<8x128xf32>
    %35 = arith.divf %33, %34 : vector<8x128xf32>
    %36 = vector.broadcast %9 : f32 to vector<8x128xf32>
    %37 = arith.mulf %35, %36 : vector<8x128xf32>
    %38 = arith.addf %26, %37 : vector<8x128xf32>
    %39 = vector.broadcast %2 : f32 to vector<8x128xf32>
    %40 = arith.mulf %13, %39 : vector<8x128xf32>
    %41 = vector.broadcast %6 : f32 to vector<8x128xf32>
    %42 = arith.addf %40, %41 : vector<8x128xf32>
    %43 = arith.negf %42 : vector<8x128xf32>
    %44 = math.exp %43 : vector<8x128xf32>
    %cst_3 = arith.constant 1.000000e+00 : f32
    %45 = vector.broadcast %cst_3 : f32 to vector<8x128xf32>
    %46 = arith.addf %45, %44 : vector<8x128xf32>
    %47 = arith.divf %45, %46 : vector<8x128xf32>
    %48 = vector.broadcast %10 : f32 to vector<8x128xf32>
    %49 = arith.mulf %47, %48 : vector<8x128xf32>
    %50 = arith.addf %38, %49 : vector<8x128xf32>
    %51 = vector.broadcast %3 : f32 to vector<8x128xf32>
    %52 = arith.mulf %13, %51 : vector<8x128xf32>
    %53 = vector.broadcast %7 : f32 to vector<8x128xf32>
    %54 = arith.addf %52, %53 : vector<8x128xf32>
    %55 = arith.negf %54 : vector<8x128xf32>
    %56 = math.exp %55 : vector<8x128xf32>
    %cst_4 = arith.constant 1.000000e+00 : f32
    %57 = vector.broadcast %cst_4 : f32 to vector<8x128xf32>
    %58 = arith.addf %57, %56 : vector<8x128xf32>
    %59 = arith.divf %57, %58 : vector<8x128xf32>
    %60 = vector.broadcast %11 : f32 to vector<8x128xf32>
    %61 = arith.mulf %59, %60 : vector<8x128xf32>
    %62 = arith.addf %50, %61 : vector<8x128xf32>
    %c0_5 = arith.constant 0 : index
    %c0_6 = arith.constant 0 : index
    %63 = vector.load %arg3[%c0_5, %c0_6] : memref<8x128xf32, #tpu.memory_space<vmem>>, vector<8x128xf32>
    tpu.vector_store %arg3[%c0_5, %c0_6], %62 {strides = array<i32>} : memref<8x128xf32, #tpu.memory_space<vmem>>, vector<8x128xf32>,
    return
  }
  func.func @transform_0(%arg0: i32, %arg1: memref<13xf32, #tpu.memory_space<smem>>) -> (i32, i32) {
    %c0_i32 = arith.constant 0 : i32
    %c0_i32_0 = arith.constant 0 : i32
    return %c0_i32, %arg0 : i32, i32
  }
  func.func @transform_1(%arg0: i32, %arg1: memref<13xf32, #tpu.memory_space<smem>>) -> (i32, i32) {
    %c0_i32 = arith.constant 0 : i32
    %c0_i32_0 = arith.constant 0 : i32
    return %c0_i32, %arg0 : i32, i32
  }
}

</mosaic_0001>

<bundles_post_ra>
// kernel: tpu_custom_call.1
= control target key start
LH: loop header
LB: loop body
LE: loop exit
PB: predicated region body
PF: predicated region fallthrough
CT: control target
= control target key end

     0   :  { %s198_s9 = smov [#allocation3]   ;;  %s225_s0 = inlined_call_operand.hbm [shape: f32[13], index: 0, kind: input, shape index: {}]   ;;  %s226_s1 = inlined_call_operand.hbm [shape: f32[8,128], index: 1, kind: input, shape index: {}]   ;;  %s227_s2 = inlined_call_operand.hbm [shape: f32[8,128], index: 2, kind: output, shape index: {}]  }
   0x1   :  { %8 = dma.hbm_to_smem %s225_s0, 16, %s198_s9, [#allocation2] }
   0x2   :  { %192 = dma.done.wait [#allocation2], 16 }
   0x3   :  { %193 = vsyncadd [#allocation2], 4294967280 }
   0x4   :  { %10 = sfence }
   0x5   :  { %11 = vsyncpa [#allocation5], 0 }
   0x6   :  { %12 = vsyncpa [#allocation6], 0  ;;  %s199_s12 = smov [#allocation4]  }
   0x7   :  { %s19_s13 = sshll.u32 %s199_s12, 4  ;;  %s20_s13 = int_to_ptr.vmem [resolvable:$true] %s19_s13 }
   0x8   :  { %s160_s14 = scalar_lea.vmem %s20_s13, 128  ;;  %p165_p1 = scmp.lt.s32.totalorder %s20_s13, %s20_s13 }
   0x9   :  { %p161_p0 = scmp.ne.s32.totalorder %s20_s13, %s160_s14  ;;  %p166_p2 = scmp.lt.s32.totalorder %s160_s14, %s160_s14 }
   0xb   :  { %p167_p3 = por %p166_p2, %p165_p1 }
   0xd   :  { %p168_p4 = pnand %p167_p3, %p161_p0 }
   0xf   :  { %171 = shalt.err (!%p168_p4)
}
  0x10   :  { %22 = dma.hbm_to_vmem [thread:$0]  %s226_s1, 128, %s20_s13, [#allocation5]  }
  0x11   :  { %194 = dma.done.wait [#allocation5], 128  }
  0x12   :  { %195 = vsyncadd [#allocation5], 4294967168  ;;  %s26_s0 = sld [smem:[#allocation3]]  ;;  %v39_v0 = vld [vmem:[#allocation4] sm:$0xff]  ;;  %s200_s28 = smov [#allocation7]  }
  0x13   :  { %s109_s17 = sld [smem:[#allocation3 + $0x1]]  ;;  %s100_s29 = sshll.u32 %s200_s28, 4  ;;  %s101_s29 = int_to_ptr.vmem [resolvable:$true] %s100_s29 }
  0x14   :  { %s110_s18 = sld [smem:[#allocation3 + $0x2]]  ;;  %s172_s30 = scalar_lea.vmem %s101_s29, 128 }
  0x15   :  { %s111_s19 = sld [smem:[#allocation3 + $0x3]]  ;;  %p173_p5 = scmp.ne.s32.totalorder %s101_s29, %s172_s30 }
  0x16   :  { %s112_s20 = sld [smem:[#allocation3 + $0x4]]  ;;  %p177_p6 = scmp.lt.s32.totalorder %s101_s29, %s101_s29 }
  0x17   :  { %s113_s21 = sld [smem:[#allocation3 + $0x5]]  ;;  %p178_p7 = scmp.lt.s32.totalorder %s172_s30, %s172_s30 }
  0x18   :  { %s114_s22 = sld [smem:[#allocation3 + $0x6]]  ;;  %v41_v1 = vstv %s26_s0 }
  0x19   :  { %s115_s23 = sld [smem:[#allocation3 + $0x7]]  ;;  %v42_v2 = vmul.f32 %v41_v1, %v39_v0  ;;  %v54_v3 = vstv %s109_s17  ;;  %p179_p8 = por %p178_p7, %p177_p6 }
  0x1a   :  { %v55_v4 = vmul.f32 %v54_v3, %v39_v0  ;;  %v67_v5 = vstv %s110_s18  ;;  %s116_s1 = sld [smem:[#allocation3 + $0x8]] }
  0x1b   :  { %v68_v6 = vmul.f32 %v67_v5, %v39_v0  ;;  %v80_v7 = vstv %s111_s19  ;;  %s117_s24 = sld [smem:[#allocation3 + $0x9]]  ;;  %p180_p9 = pnand %p179_p8, %p173_p5 }
  0x1c   :  { %v43_v8 = vstv %s112_s20  ;;  %v81_v9 = vmul.f32 %v80_v7, %v39_v0  ;;  %s118_s25 = sld [smem:[#allocation3 + $0xa]] }
  0x1d   :  { %v44_v10 = vadd.f32 %v43_v8, %v42_v2  ;;  %v56_v11 = vstv %s113_s21  ;;  %s120_s26 = sld [smem:[#allocation3 + $0xc]] }
  0x1e   :  { %v57_v12 = vadd.f32 %v56_v11, %v55_v4  ;;  %v69_v13 = vstv %s114_s22  ;;  %s119_s27 = sld [smem:[#allocation3 + $0xb]] }
  0x1f   :  { %v121_v14 = vmul.f32 -1.442695, %v44_v10  ;;  %v70_v15 = vadd.f32 %v69_v13, %v68_v6  ;;  %v82_v16 = vstv %s115_s23 }
  0x20   :  { %v122_v17 = vmul.f32 -1.442695, %v57_v12  ;;  %v83_v18 = vadd.f32 %v82_v16, %v81_v9  ;;  %v51_v29 = vstv %s116_s1 }
  0x21   :  { %128 = vpow2.f32 %v121_v14  ;;  %v123_v19 = vmul.f32 -1.442695, %v70_v15  ;;  %v64_v30 = vstv %s117_s24 }
  0x22   :  { %130 = vpow2.f32 %v122_v17  ;;  %v124_v20 = vmul.f32 -1.442695, %v83_v18  ;;  %v77_v33 = vstv %s118_s25 }
  0x23   :  { %132 = vpow2.f32 %v123_v19  ;;  %v40_v32 = vstv %s120_s26 }
  0x24   :  { %134 = vpow2.f32 %v124_v20  ;;  %v90_v38 = vstv %s119_s27 }
  0x2e   :  { %v129_v21 = vpop.eup %128 }
  0x2f   :  { %v131_v22 = vpop.eup %130  ;;  %v48_v23 = vadd.f32 1.0, %v129_v21 }
  0x30   :  { %v133_v24 = vpop.eup %132  ;;  %v61_v25 = vadd.f32 1.0, %v131_v22 }
  0x31   :  { %v135_v26 = vpop.eup %134  ;;  %136 = vrcp.f32 %v48_v23  ;;  %v74_v27 = vadd.f32 1.0, %v133_v24 }
  0x32   :  { %138 = vrcp.f32 %v61_v25  ;;  %v87_v28 = vadd.f32 1.0, %v135_v26 }
  0x33   :  { %140 = vrcp.f32 %v74_v27 }
  0x34   :  { %142 = vrcp.f32 %v87_v28 }
  0x3e   :  { %v137_v31 = vpop.eup %136 }
  0x3f   :  { %v139_v34 = vpop.eup %138  ;;  %v52_v35 = vmul.f32 %v137_v31, %v51_v29 }
  0x40   :  { %v141_v36 = vpop.eup %140  ;;  %v65_v37 = vmul.f32 %v139_v34, %v64_v30 }
  0x41   :  { %v143_v39 = vpop.eup %142  ;;  %v53_v40 = vadd.f32 %v52_v35, %v40_v32  ;;  %v78_v41 = vmul.f32 %v141_v36, %v77_v33 }
  0x42   :  { %v91_v43 = vmul.f32 %v143_v39, %v90_v38 }
  0x43   :  { %v66_v42 = vadd.f32 %v65_v37, %v53_v40 }
  0x45   :  { %v79_v44 = vadd.f32 %v78_v41, %v66_v42 }
  0x47   :  { %v92_v45 = vadd.f32 %v91_v43, %v79_v44 }
  0x49   :  { %93 = vst [vmem:[#allocation7] sm:$0xff] %v92_v45 }
  0x4a   :  { %183 = shalt.err (!%p180_p9)
}
  0x4b   :  { %103 = dma.vmem_to_hbm [thread:$0]  %s101_s29, 128, %s227_s2, [#allocation6]  }
  0x4c   :  { %196 = dma.done.wait [#allocation6], 128  }
  0x4d   :  { %197 = vsyncadd [#allocation6], 4294967168 }
  0x4e   :  { %107 = vsyncpa [#allocation5], 1 }
  0x4f   :  { %108 = vsyncpa [#allocation6], 1 }

</bundles_post_ra>
